<compile_context>
chip_gen: v5e
topology: v5e:2x2
jax: 0.10.0
libtpu: 0.0.40
codegen_flags: <defaults>
</compile_context>

<pallas_src>
import jax
import jax.numpy as jnp
from jax import lax
from jax.experimental import pallas as pl
from jax.experimental.pallas import tpu as pltpu

LN_EPS = 1e-5
_DEFAULT_TILE_BYTES = 4 << 20     # target size of one x token tile in VMEM
_MIN_TILE_ROWS = 256              # row floor before clamping to the token count
_MEGACORE_SPLIT_ROWS = 1024       # only force >=2 grid steps above this much work


def _round_up(x, m):
    return ((x + m - 1) // m) * m


def _sublane_multiple(dtype):
    # sublane packing: 8 rows for 4-byte, 16 for 2-byte, 32 for 1-byte dtypes
    return max(8, 32 // jnp.dtype(dtype).itemsize)


def _vmem_cap_bytes():
    # Generation-aware ceiling (v5e/v6e: 128 MiB, v7x: 64 MiB per TC), with headroom.
    try:
        cap = int(pltpu.get_tpu_info().vmem_capacity_bytes)
    except Exception:
        cap = 64 << 20  # conservative fallback = smallest per-TC VMEM across v5e/v6e/v7x
    return int(cap * 0.85)


def _vmem_estimate(tm, C, x_itemsize, w_itemsize, out_itemsize, weight_bufs):
    x_buf = 2 * tm * C * x_itemsize            # double-buffered input tile
    o_buf = 2 * tm * C * out_itemsize          # double-buffered output tile
    w_buf = weight_bufs * C * C * w_itemsize   # weight (1 buf when Buffered(1))
    p_buf = 8 * C * 4                          # fused bias/gamma/beta (sublane padded)
    ln_tmp = 4 * tm * C * 4                    # f32 LN intermediates (y, centered, y_norm, resid)
    return x_buf + o_buf + w_buf + p_buf + ln_tmp


def _linear_resblock_kernel(x_ref, wt_ref, p_ref, o_ref):
    # x_ref:  (TM, C) token tile
    # wt_ref: (C, C)  transposed Linear weight, already in the matmul dtype
    # p_ref:  (3, C)  f32 rows = [bias, gamma, beta]
    x = x_ref[...]

    # Linear: y = x @ W.T + b (MXU, f32 accumulate). The x cast is a no-op unless
    # an opt-in lower-precision matmul dtype was requested in the wrapper.
    y = jnp.dot(x.astype(wt_ref.dtype), wt_ref[...], preferred_element_type=jnp.float32)

    p = p_ref[...]
    y = y + p[0:1, :]

    # LayerNorm over the feature (last) axis -- per-row, so garbage rows in a
    # partial boundary tile never affect valid rows.
    mean = jnp.mean(y, axis=-1, keepdims=True)
    centered = y - mean
    var = jnp.mean(centered * centered, axis=-1, keepdims=True)
    y_norm = centered * lax.rsqrt(var + LN_EPS)
    y_norm = y_norm * p[1:2, :] + p[2:3, :]

    # ReLU + residual in f32, single cast on store.
    o_ref[...] = (x.astype(jnp.float32) + jnp.maximum(y_norm, 0.0)).astype(o_ref.dtype)


def linear_resblock(x, w, b, gamma, beta, *, tile_m=None, matmul_dtype=None):
    """x: (..., C). w: (C, C) PyTorch Linear weight (out, in).

    Returns x + relu(LayerNorm(x @ w.T + b)).

    matmul_dtype: optional opt-in (e.g. jnp.bfloat16) for the MXU operands on
    MXU-bound large-C cases; accumulation / LN / residual stay f32.
    """
    orig_shape = x.shape
    C = orig_shape[-1]
    x2 = x.reshape(-1, C)
    N = x2.shape[0]
    if N == 0:
        return x  # empty input: nothing to do

    x_dtype = x2.dtype
    mm_dtype = jnp.dtype(matmul_dtype) if matmul_dtype is not None else jnp.dtype(x_dtype)
    x_itemsize = jnp.dtype(x_dtype).itemsize
    w_itemsize = mm_dtype.itemsize

    sub = _sublane_multiple(x_dtype)
    n_ceil = _round_up(N, sub)

    # ---- token tile: scale with C (target a few MiB of x per tile), honor override.
    if tile_m is not None:
        tm = _round_up(max(int(tile_m), 1), sub)
    else:
        tm = max(_DEFAULT_TILE_BYTES // max(C * x_itemsize, 1), _MIN_TILE_ROWS)
        tm = _round_up(tm, sub)
    tm = min(tm, n_ceil)

    # v7x megacore: the "parallel" token axis shards across the 2 TensorCores, so
    # keep >= 2 grid steps when there is enough work to make the split worthwhile.
    if n_ceil >= _MEGACORE_SPLIT_ROWS:
        tm = min(tm, _round_up(pl.cdiv(N, 2), sub))
    tm = max(tm, sub)

    # ---- VMEM budget (generation aware): shrink the tile before overrunning it.
    cap = _vmem_cap_bytes()
    while tm > sub and _vmem_estimate(tm, C, x_itemsize, w_itemsize, x_itemsize, 1) > cap:
        tm = max(_round_up(tm // 2, sub), sub)

    grid = (pl.cdiv(N, tm),)  # no wrapper pad/slice: Pallas masks the boundary tile

    # Weight transposed + cast ONCE in the wrapper (kernel does x @ wt == x @ w.T).
    wt = w.T.astype(mm_dtype)
    # Fuse bias / gamma / beta into one grid-invariant (3, C) f32 input.
    params = jnp.stack(
        [b.reshape(C), gamma.reshape(C), beta.reshape(C)]
    ).astype(jnp.float32)

    est = _vmem_estimate(tm, C, x_itemsize, w_itemsize, x_itemsize, 1)
    vmem_limit = int(min(max(int(1.25 * est), 32 << 20), cap))

    cost = pl.CostEstimate(
        flops=2 * N * C * C + 10 * N * C,
        transcendentals=N,  # one rsqrt per token row
        bytes_accessed=2 * N * C * x_itemsize + C * C * w_itemsize + 3 * C * 4,
    )

    def _call(single_buffer_invariants):
        inv = {"pipeline_mode": pl.Buffered(1)} if single_buffer_invariants else {}
        in_specs = [
            pl.BlockSpec((tm, C), lambda i: (i, 0)),        # x tile (double-buffered)
            pl.BlockSpec((C, C), lambda i: (0, 0), **inv),  # weight (grid-invariant)
            pl.BlockSpec((3, C), lambda i: (0, 0), **inv),  # bias/gamma/beta
        ]
        return pl.pallas_call(
            _linear_resblock_kernel,
            out_shape=jax.ShapeDtypeStruct((N, C), x_dtype),
            grid=grid,
            in_specs=in_specs,
            out_specs=pl.BlockSpec((tm, C), lambda i: (i, 0)),
            compiler_params=pltpu.CompilerParams(
                dimension_semantics=("parallel",),
                vmem_limit_bytes=vmem_limit,
            ),
            cost_estimate=cost,
        )(x2, wt, params)

    try:
        out = _call(True)
    except Exception:
        # pipeline_mode=pl.Buffered(1) rejected on this jax build -> fall back to
        # default double-buffering of the grid-invariant inputs.
        out = _call(False)

    return out.reshape(orig_shape)


def _reference(x, w, b, gamma, beta):
    y = jnp.einsum("...i,oi->...o", x, w) + b
    mean = jnp.mean(y, axis=-1, keepdims=True)
    var = jnp.mean((y - mean) ** 2, axis=-1, keepdims=True)
    yn = (y - mean) / jnp.sqrt(var + LN_EPS)
    yn = yn * gamma + beta
    return x + jnp.maximum(yn, 0.0)


if __name__ == "__main__":
    key = jax.random.PRNGKey(0)
    batch, seq, in_ch = 2, 8, 32

    k_x, k_w, k_b, k_g, k_beta, k_x2 = jax.random.split(key, 6)
    x = jax.random.normal(k_x, (batch, seq, in_ch), dtype=jnp.float32)

    # Deterministic parameter init (PyTorch shapes: Linear weight (C, C), bias (C,);
    # LayerNorm weight (C,), bias (C,)). Randomized gamma/beta exercise the affine.
    bound = 1.0 / (in_ch ** 0.5)
    w = jax.random.uniform(k_w, (in_ch, in_ch), jnp.float32, -bound, bound)
    b = jax.random.uniform(k_b, (in_ch,), jnp.float32, -bound, bound)
    gamma = 1.0 + 0.1 * jax.random.normal(k_g, (in_ch,), dtype=jnp.float32)
    beta = 0.1 * jax.random.normal(k_beta, (in_ch,), dtype=jnp.float32)

    out = jax.block_until_ready(linear_resblock(x, w, b, gamma, beta))
    ref = _reference(x, w, b, gamma, beta)
    assert out.shape == x.shape
    assert jnp.allclose(out, ref, atol=1e-5, rtol=1e-5), "mismatch vs reference"

    # Second check: token count not a multiple of the sublane packing / tile
    # (exercises the masked partial boundary tile -- no wrapper pad/slice anymore).
    x_odd = jax.random.normal(k_x2, (3, 7, in_ch), dtype=jnp.float32)
    out_odd = jax.block_until_ready(linear_resblock(x_odd, w, b, gamma, beta))
    ref_odd = _reference(x_odd, w, b, gamma, beta)
    assert out_odd.shape == x_odd.shape
    assert jnp.allclose(out_odd, ref_odd, atol=1e-5, rtol=1e-5), "mismatch (partial tile) vs reference"

    print("KERNEL_OK")
</pallas_src>

<mosaic_0001>
module attributes {stable_mosaic.version = 11 : i64} {
  func.func @_linear_resblock_kernel(%arg0: i32, %arg1: memref<16x32xf32, #tpu.memory_space<vmem>>, %arg2: memref<32x32xf32, #tpu.memory_space<vmem>>, %arg3: memref<3x32xf32, #tpu.memory_space<vmem>>, %arg4: memref<16x32xf32, #tpu.memory_space<vmem>>) attributes {dimension_semantics = [#tpu.dimension_semantics<parallel>], iteration_bounds = array<i64: 1>, scalar_prefetch = 0 : i64, scratch_operands = 0 : i64, tpu.core_type = #tpu.core_type<tc>, window_params = [{transform_indices = @transform_0, window_bounds = array<i64: 16, 32>}, {pipeline_mode = #tpu.pipeline_mode<synchronous>, transform_indices = @transform_1, window_bounds = array<i64: 32, 32>}, {pipeline_mode = #tpu.pipeline_mode<synchronous>, transform_indices = @transform_2, window_bounds = array<i64: 3, 32>}, {transform_indices = @transform_3, window_bounds = array<i64: 16, 32>}]} {
    %c0 = arith.constant 0 : index
    %c0_0 = arith.constant 0 : index
    %0 = vector.load %arg1[%c0, %c0_0] : memref<16x32xf32, #tpu.memory_space<vmem>>, vector<16x32xf32>
    %c0_1 = arith.constant 0 : index
    %c0_2 = arith.constant 0 : index
    %1 = vector.load %arg2[%c0_1, %c0_2] : memref<32x32xf32, #tpu.memory_space<vmem>>, vector<32x32xf32>
    %cst = arith.constant dense<0.000000e+00> : vector<16x32xf32>
    %2 = tpu.matmul %0, %1, %cst {dimension_numbers = #tpu.dot_dimension_numbers<[1], [0], [0], [1], [0, 0, 1, 1], [], []>} : vector<16x32xf32>, vector<32x32xf32>, vector<16x32xf32> -> vector<16x32xf32>
    %c0_3 = arith.constant 0 : index
    %c0_4 = arith.constant 0 : index
    %3 = vector.load %arg3[%c0_3, %c0_4] : memref<3x32xf32, #tpu.memory_space<vmem>>, vector<3x32xf32>
    %4 = vector.extract_strided_slice %3 {offsets = [0, 0], sizes = [1, 32], strides = [1, 1]} : vector<3x32xf32> to vector<1x32xf32>
    %5 = vector.broadcast %4 : vector<1x32xf32> to vector<16x32xf32>
    %6 = arith.addf %2, %5 : vector<16x32xf32>
    %cst_5 = arith.constant dense<0.000000e+00> : vector<16xf32>
    %7 = vector.multi_reduction <add>, %6, %cst_5 [1] : vector<16x32xf32> to vector<16xf32>
    %8 = vector.shape_cast %7 : vector<16xf32> to vector<16x1xf32>
    %cst_6 = arith.constant 3.200000e+01 : f32
    %9 = vector.broadcast %cst_6 : f32 to vector<16x1xf32>
    %10 = arith.divf %8, %9 : vector<16x1xf32>
    %11 = vector.broadcast %10 : vector<16x1xf32> to vector<16x32xf32>
    %12 = arith.subf %6, %11 : vector<16x32xf32>
    %13 = arith.mulf %12, %12 : vector<16x32xf32>
    %cst_7 = arith.constant dense<0.000000e+00> : vector<16xf32>
    %14 = vector.multi_reduction <add>, %13, %cst_7 [1] : vector<16x32xf32> to vector<16xf32>
    %15 = vector.shape_cast %14 : vector<16xf32> to vector<16x1xf32>
    %cst_8 = arith.constant 3.200000e+01 : f32
    %16 = vector.broadcast %cst_8 : f32 to vector<16x1xf32>
    %17 = arith.divf %15, %16 : vector<16x1xf32>
    %cst_9 = arith.constant 9.99999974E-6 : f32
    %18 = vector.broadcast %cst_9 : f32 to vector<16x1xf32>
    %19 = arith.addf %17, %18 : vector<16x1xf32>
    %20 = math.rsqrt %19 : vector<16x1xf32>
    %21 = vector.broadcast %20 : vector<16x1xf32> to vector<16x32xf32>
    %22 = arith.mulf %12, %21 : vector<16x32xf32>
    %23 = vector.extract_strided_slice %3 {offsets = [1, 0], sizes = [1, 32], strides = [1, 1]} : vector<3x32xf32> to vector<1x32xf32>
    %24 = vector.broadcast %23 : vector<1x32xf32> to vector<16x32xf32>
    %25 = arith.mulf %22, %24 : vector<16x32xf32>
    %26 = vector.extract_strided_slice %3 {offsets = [2, 0], sizes = [1, 32], strides = [1, 1]} : vector<3x32xf32> to vector<1x32xf32>
    %27 = vector.broadcast %26 : vector<1x32xf32> to vector<16x32xf32>
    %28 = arith.addf %25, %27 : vector<16x32xf32>
    %cst_10 = arith.constant 0.000000e+00 : f32
    %29 = vector.broadcast %cst_10 : f32 to vector<16x32xf32>
    %30 = arith.maximumf %28, %29 : vector<16x32xf32>
    %31 = arith.addf %0, %30 : vector<16x32xf32>
    %c0_11 = arith.constant 0 : index
    %c0_12 = arith.constant 0 : index
    %32 = vector.load %arg4[%c0_11, %c0_12] : memref<16x32xf32, #tpu.memory_space<vmem>>, vector<16x32xf32>
    tpu.vector_store %arg4[%c0_11, %c0_12], %31 {strides = array<i32>} : memref<16x32xf32, #tpu.memory_space<vmem>>, vector<16x32xf32>,
    return
  }
  func.func @transform_0(%arg0: i32) -> (i32, i32) {
    %c0_i32 = arith.constant 0 : i32
    %c0_i32_0 = arith.constant 0 : i32
    return %arg0, %c0_i32 : i32, i32
  }
  func.func @transform_1(%arg0: i32) -> (i32, i32) {
    %c0_i32 = arith.constant 0 : i32
    %c0_i32_0 = arith.constant 0 : i32
    %c0_i32_1 = arith.constant 0 : i32
    return %c0_i32, %c0_i32_0 : i32, i32
  }
  func.func @transform_2(%arg0: i32) -> (i32, i32) {
    %c0_i32 = arith.constant 0 : i32
    %c0_i32_0 = arith.constant 0 : i32
    %c0_i32_1 = arith.constant 0 : i32
    return %c0_i32, %c0_i32_0 : i32, i32
  }
  func.func @transform_3(%arg0: i32) -> (i32, i32) {
    %c0_i32 = arith.constant 0 : i32
    %c0_i32_0 = arith.constant 0 : i32
    return %arg0, %c0_i32 : i32, i32
  }
}

module attributes {stable_mosaic.version = 11 : i64} {
  func.func @_linear_resblock_kernel(%arg0: i32, %arg1: memref<16x32xf32, #tpu.memory_space<vmem>>, %arg2: memref<32x32xf32, #tpu.memory_space<vmem>>, %arg3: memref<3x32xf32, #tpu.memory_space<vmem>>, %arg4: memref<16x32xf32, #tpu.memory_space<vmem>>) attributes {dimension_semantics = [#tpu.dimension_semantics<parallel>], iteration_bounds = array<i64: 1>, scalar_prefetch = 0 : i64, scratch_operands = 0 : i64, tpu.core_type = #tpu.core_type<tc>, window_params = [{transform_indices = @transform_0, window_bounds = array<i64: 16, 32>}, {pipeline_mode = #tpu.pipeline_mode<synchronous>, transform_indices = @transform_1, window_bounds = array<i64: 32, 32>}, {pipeline_mode = #tpu.pipeline_mode<synchronous>, transform_indices = @transform_2, window_bounds = array<i64: 3, 32>}, {transform_indices = @transform_3, window_bounds = array<i64: 16, 32>}]} {
    %c0 = arith.constant 0 : index
    %c0_0 = arith.constant 0 : index
    %0 = vector.load %arg1[%c0, %c0_0] : memref<16x32xf32, #tpu.memory_space<vmem>>, vector<16x32xf32>
    %c0_1 = arith.constant 0 : index
    %c0_2 = arith.constant 0 : index
    %1 = vector.load %arg2[%c0_1, %c0_2] : memref<32x32xf32, #tpu.memory_space<vmem>>, vector<32x32xf32>
    %cst = arith.constant dense<0.000000e+00> : vector<16x32xf32>
    %2 = tpu.matmul %0, %1, %cst {dimension_numbers = #tpu.dot_dimension_numbers<[1], [0], [0], [1], [0, 0, 1, 1], [], []>} : vector<16x32xf32>, vector<32x32xf32>, vector<16x32xf32> -> vector<16x32xf32>
    %c0_3 = arith.constant 0 : index
    %c0_4 = arith.constant 0 : index
    %3 = vector.load %arg3[%c0_3, %c0_4] : memref<3x32xf32, #tpu.memory_space<vmem>>, vector<3x32xf32>
    %4 = vector.extract_strided_slice %3 {offsets = [0, 0], sizes = [1, 32], strides = [1, 1]} : vector<3x32xf32> to vector<1x32xf32>
    %5 = vector.broadcast %4 : vector<1x32xf32> to vector<16x32xf32>
    %6 = arith.addf %2, %5 : vector<16x32xf32>
    %cst_5 = arith.constant dense<0.000000e+00> : vector<16xf32>
    %7 = vector.multi_reduction <add>, %6, %cst_5 [1] : vector<16x32xf32> to vector<16xf32>
    %8 = vector.shape_cast %7 : vector<16xf32> to vector<16x1xf32>
    %cst_6 = arith.constant 3.200000e+01 : f32
    %9 = vector.broadcast %cst_6 : f32 to vector<16x1xf32>
    %10 = arith.divf %8, %9 : vector<16x1xf32>
    %11 = vector.broadcast %10 : vector<16x1xf32> to vector<16x32xf32>
    %12 = arith.subf %6, %11 : vector<16x32xf32>
    %13 = arith.mulf %12, %12 : vector<16x32xf32>
    %cst_7 = arith.constant dense<0.000000e+00> : vector<16xf32>
    %14 = vector.multi_reduction <add>, %13, %cst_7 [1] : vector<16x32xf32> to vector<16xf32>
    %15 = vector.shape_cast %14 : vector<16xf32> to vector<16x1xf32>
    %cst_8 = arith.constant 3.200000e+01 : f32
    %16 = vector.broadcast %cst_8 : f32 to vector<16x1xf32>
    %17 = arith.divf %15, %16 : vector<16x1xf32>
    %cst_9 = arith.constant 9.99999974E-6 : f32
    %18 = vector.broadcast %cst_9 : f32 to vector<16x1xf32>
    %19 = arith.addf %17, %18 : vector<16x1xf32>
    %20 = math.rsqrt %19 : vector<16x1xf32>
    %21 = vector.broadcast %20 : vector<16x1xf32> to vector<16x32xf32>
    %22 = arith.mulf %12, %21 : vector<16x32xf32>
    %23 = vector.extract_strided_slice %3 {offsets = [1, 0], sizes = [1, 32], strides = [1, 1]} : vector<3x32xf32> to vector<1x32xf32>
    %24 = vector.broadcast %23 : vector<1x32xf32> to vector<16x32xf32>
    %25 = arith.mulf %22, %24 : vector<16x32xf32>
    %26 = vector.extract_strided_slice %3 {offsets = [2, 0], sizes = [1, 32], strides = [1, 1]} : vector<3x32xf32> to vector<1x32xf32>
    %27 = vector.broadcast %26 : vector<1x32xf32> to vector<16x32xf32>
    %28 = arith.addf %25, %27 : vector<16x32xf32>
    %cst_10 = arith.constant 0.000000e+00 : f32
    %29 = vector.broadcast %cst_10 : f32 to vector<16x32xf32>
    %30 = arith.maximumf %28, %29 : vector<16x32xf32>
    %31 = arith.addf %0, %30 : vector<16x32xf32>
    %c0_11 = arith.constant 0 : index
    %c0_12 = arith.constant 0 : index
    %32 = vector.load %arg4[%c0_11, %c0_12] : memref<16x32xf32, #tpu.memory_space<vmem>>, vector<16x32xf32>
    tpu.vector_store %arg4[%c0_11, %c0_12], %31 {strides = array<i32>} : memref<16x32xf32, #tpu.memory_space<vmem>>, vector<16x32xf32>,
    return
  }
  func.func @transform_0(%arg0: i32) -> (i32, i32) {
    %c0_i32 = arith.constant 0 : i32
    %c0_i32_0 = arith.constant 0 : i32
    return %arg0, %c0_i32 : i32, i32
  }
  func.func @transform_1(%arg0: i32) -> (i32, i32) {
    %c0_i32 = arith.constant 0 : i32
    %c0_i32_0 = arith.constant 0 : i32
    %c0_i32_1 = arith.constant 0 : i32
    return %c0_i32, %c0_i32_0 : i32, i32
  }
  func.func @transform_2(%arg0: i32) -> (i32, i32) {
    %c0_i32 = arith.constant 0 : i32
    %c0_i32_0 = arith.constant 0 : i32
    %c0_i32_1 = arith.constant 0 : i32
    return %c0_i32, %c0_i32_0 : i32, i32
  }
  func.func @transform_3(%arg0: i32) -> (i32, i32) {
    %c0_i32 = arith.constant 0 : i32
    %c0_i32_0 = arith.constant 0 : i32
    return %arg0, %c0_i32 : i32, i32
  }
}

</mosaic_0001>

<bundles_post_ra>
// kernel: tpu_custom_call.1
= control target key start
LH: loop header
LB: loop body
LE: loop exit
PB: predicated region body
PF: predicated region fallthrough
CT: control target
= control target key end

     0   :  { %8 = vsyncpa [#allocation3], 0  ;;  %s371_s0 = inlined_call_operand.hbm [shape: f32[16,32], index: 0, kind: input, shape index: {}]   ;;  %s372_s1 = inlined_call_operand.hbm [shape: f32[32,32], index: 1, kind: input, shape index: {}]   ;;  %s373_s2 = inlined_call_operand.hbm [shape: f32[3,32], index: 2, kind: input, shape index: {}]   ;;  %s374_s3 = inlined_call_operand.hbm [shape: f32[16,32], index: 3, kind: output, shape index: {}]  }
   0x1   :  { %9 = vsyncpa [#allocation6], 0 }
   0x2   :  { %10 = vsyncpa [#allocation4], 0  ;;  %s28_s14 = sshll.u32 %s372_s1, 4  ;;  %s302_s15 = smov [#allocation5]   ;;  %s29_s14 = int_to_ptr.hbm [resolvable:$true] %s28_s14 }
   0x3   :  { %s30_s16 = sshll.u32 %s302_s15, 4  ;;  %s15_s19 = sshll.u32 %s371_s0, 4  ;;  %s31_s16 = int_to_ptr.vmem [resolvable:$true] %s30_s16  ;;  %s16_s19 = int_to_ptr.hbm [resolvable:$true] %s15_s19 }
   0x4   :  { %s303_s20 = smov 128   ;;  %s304_s21 = smov 8  }
   0x5   :  { %36 = dma.hbm_to_vmem [thread:$0]  %s29_s14, 512, %s31_s16, [#allocation6], %s303_s20, %s303_s20, %s304_s21  }
   0x6   :  { %s305_s22 = smov [#allocation2]   ;;  %s42_s1 = sshll.u32 %s373_s2, 4  ;;  %s43_s1 = int_to_ptr.hbm [resolvable:$true] %s42_s1 }
   0x7   :  { %s17_s23 = sshll.u32 %s305_s22, 4  ;;  %s306_s0 = smov [#allocation7]   ;;  %s18_s23 = int_to_ptr.vmem [resolvable:$true] %s17_s23 }
   0x8   :  { %23 = dma.hbm_to_vmem [thread:$0]  %s16_s19, 256, %s18_s23, [#allocation3], %s303_s20, %s303_s20, %s304_s21  }
   0x9   :  { %s44_s26 = sshll.u32 %s306_s0, 4  ;;  %s45_s26 = int_to_ptr.vmem [resolvable:$true] %s44_s26 }
   0xa   :  { %47 = dma.hbm_to_vmem [thread:$0]  %s43_s1, 64, %s45_s26, [#allocation6]  }
   0xb   :  { %296 = dma.done.wait [#allocation3], 256  }
   0xc   :  { %297 = vsyncadd [#allocation3], 4294967040 }
   0xd   :  { %298 = dma.done.wait [#allocation6], 576  }
   0xe   :  { %299 = vsyncadd [#allocation6], 4294966720  ;;  %v65_v0 = vld [vmem:[#allocation5 + $0x18] sm:$0xff]  ;;  %v64_v1 = vld [vmem:[#allocation5 + $0x10] sm:$0xff]  ;;  %vm68_vm0 = vcmask 261120   ;;  %v307_v14 = vmov 32.0  }
   0xf   :  { %87 = vmatpush.msra.mxu0 %v65_v0  ;;  %183 = vmatpush.msra.mxu1 %v65_v0  ;;  %v63_v2 = vld [vmem:[#allocation5 + $0x8] sm:$0xff]  ;;  %v62_v3 = vld [vmem:[#allocation5] sm:$0xff]  ;;  %v344_v4 = vld [vmem:[#allocation2] sm:$0xff]  ;;  %194 = vrcp.f32 %v307_v14  ;;  %s308_s2 = smov [#allocation8]   ;;  %s167_s30 = sshll.u32 %s374_s3, 4  ;;  %s168_s30 = int_to_ptr.hbm [resolvable:$true] %s167_s30 }
  0x10   :  { %v346_v5 = vld [vmem:[#allocation2 + $0x8] sm:$0xff]  ;;  %v352_v6 = vld [vmem:[#allocation7] sm:$0x7]  ;;  %s165_s27 = sshll.u32 %s308_s2, 4  ;;  %s166_s27 = int_to_ptr.vmem [resolvable:$true] %s165_s27 }
  0x11   :  { %88 = vmatpush.msra.mxu0 %v64_v1  ;;  %184 = vmatpush.msra.mxu1 %v64_v1  ;;  %v67_v7 = vperm.slane %v352_v6, 0  ;;  %v149_v45 = vperm.slane %v352_v6, 1  ;;  %v152_v48 = vperm.slane %v352_v6, 2 }
  0x13   :  { %89 = vmatpush.msra.mxu0 %v63_v2  ;;  %185 = vmatpush.msra.mxu1 %v63_v2 }
  0x15   :  { %90 = vmatpush.msra.mxu0 %v62_v3  ;;  %186 = vmatpush.msra.mxu1 %v62_v3  ;;  %v195_v15 = vpop.eup %194 }
  0x16   :  { %181 = vmatmul.msk.f32.vlgmr.msra.gmra.mxu0 %vm68_vm0, %v344_v4  ;;  %182 = vmatmul.msk.f32.vlgmr.msra.gmra.mxu1 %vm68_vm0, %v346_v5  ;;  %v105_v16 = vmul.f32 32.0, %v195_v15  ;;  %vm109_vm1 = vweird.f32 %v195_v15 }
  0x18   :  { %v106_v17 = vsub.f32 1.0, %v105_v16 }
  0x1a   :  { %v107_v18 = vmul.f32 %v195_v15, %v106_v17 }
  0x1c   :  { %v108_v19 = vadd.f32 %v195_v15, %v107_v18 }
  0x1e   :  { %v110_v20 = vsel %vm109_vm1, %v195_v15, %v108_v19 }
  0x93   :  { %v92_v8 = vpop.f32.mrf.mxu0  ;;  %v95_v10 = vpop.f32.mrf.mxu1 }
  0x94   :  { %v93_v9 = vadd.f32 %v92_v8, %v67_v7  ;;  %v96_v12 = vadd.f32 %v95_v10, %v67_v7 }
  0x96   :  { %v98_v11 = vsel %vm68_vm0, %v93_v9, 0.0  ;;  %v101_v13 = vsel %vm68_vm0, %v96_v12, 0.0 }
  0x97   :  { %99 = vadd.xlane.f32.xlu0 %v98_v11 }
  0x9f   :  { %102 = vadd.xlane.f32.xlu0 %v101_v13 }
 0x10a   :  { %v100_v21 = vpop.xlane.xlu0 %99 }
 0x10b   :  { %v111_v22 = vmul.f32 %v110_v20, %v100_v21 }
 0x10d   :  { %v113_v23 = vsub.f32 %v93_v9, %v111_v22 }
 0x10f   :  { %v115_v24 = vmul.f32 %v113_v23, %v113_v23 }
 0x111   :  { %v117_v25 = vsel %vm68_vm0, %v115_v24, 0.0 }
 0x112   :  { %118 = vadd.xlane.f32.xlu1 %v117_v25  ;;  %v103_v26 = vpop.xlane.xlu0 %102 }
 0x113   :  { %v112_v27 = vmul.f32 %v110_v20, %v103_v26 }
 0x115   :  { %v114_v28 = vsub.f32 %v96_v12, %v112_v27 }
 0x117   :  { %v116_v29 = vmul.f32 %v114_v28, %v114_v28 }
 0x119   :  { %v120_v30 = vsel %vm68_vm0, %v116_v29, 0.0 }
 0x11a   :  { %121 = vadd.xlane.f32.xlu1 %v120_v30 }
 0x185   :  { %v119_v31 = vpop.xlane.xlu1 %118 }
 0x186   :  { %v123_v32 = vmul.f32 %v119_v31, %v110_v20 }
 0x188   :  { %v125_v33 = vadd.f32 1e-05, %v123_v32 }
 0x18a   :  { %196 = vrsqrt.f32 %v125_v33  ;;  %vm133_vm3 = vweird.f32 %v125_v33 }
 0x18d   :  { %v122_v34 = vpop.xlane.xlu1 %121 }
 0x18e   :  { %v124_v35 = vmul.f32 %v122_v34, %v110_v20 }
 0x190   :  { %v197_v36 = vpop.eup %196  ;;  %v126_v37 = vadd.f32 1e-05, %v124_v35 }
 0x191   :  { %v128_v38 = vmul.f32 %v197_v36, %v125_v33  ;;  %vm134_vm2 = vweird.f32 %v197_v36 }
 0x192   :  { %198 = vrsqrt.f32 %v126_v37  ;;  %vm135_vm4 = vmor %vm133_vm3, %vm134_vm2  ;;  %vm143_vm6 = vweird.f32 %v126_v37 }
 0x193   :  { %v129_v39 = vmul.f32 %v197_v36, %v128_v38 }
 0x195   :  { %v130_v40 = vmul.f32 0.5, %v129_v39 }
 0x197   :  { %v131_v41 = vsub.f32 1.5, %v130_v40 }
 0x198   :  { %v199_v42 = vpop.eup %198 }
 0x199   :  { %v132_v43 = vmul.f32 %v197_v36, %v131_v41  ;;  %v138_v44 = vmul.f32 %v199_v42, %v126_v37  ;;  %vm144_vm5 = vweird.f32 %v199_v42 }
 0x19a   :  { %vm145_vm7 = vmor %vm143_vm6, %vm144_vm5 }
 0x19b   :  { %v136_v46 = vsel %vm135_vm4, %v197_v36, %v132_v43  ;;  %v139_v47 = vmul.f32 %v199_v42, %v138_v44 }
 0x19c   :  { %v147_v49 = vmul.f32 %v136_v46, %v113_v23 }
 0x19d   :  { %v140_v50 = vmul.f32 0.5, %v139_v47 }
 0x19e   :  { %v150_v51 = vmul.f32 %v149_v45, %v147_v49 }
 0x19f   :  { %v141_v52 = vsub.f32 1.5, %v140_v50 }
 0x1a0   :  { %v153_v53 = vadd.f32 %v152_v48, %v150_v51 }
 0x1a1   :  { %v142_v54 = vmul.f32 %v199_v42, %v141_v52 }
 0x1a2   :  { %v155_v55 = vmax.f32 %v153_v53, 0.0 }
 0x1a3   :  { %v146_v56 = vsel %vm145_vm7, %v199_v42, %v142_v54 }
 0x1a4   :  { %v148_v57 = vmul.f32 %v146_v56, %v114_v28  ;;  %v157_v58 = vadd.f32 %v155_v55, %v344_v4 }
 0x1a6   :  { %v151_v59 = vmul.f32 %v149_v45, %v148_v57  ;;  %159 = vst.msk [vmem:[#allocation8] sm:$0xff] %vm68_vm0, %v157_v58 }
 0x1a8   :  { %v154_v60 = vadd.f32 %v152_v48, %v151_v59 }
 0x1aa   :  { %v156_v61 = vmax.f32 %v154_v60, 0.0 }
 0x1ac   :  { %v158_v62 = vadd.f32 %v156_v61, %v346_v5 }
 0x1ae   :  { %160 = vst.msk [vmem:[#allocation8 + $0x8] sm:$0xff] %vm68_vm0, %v158_v62 }
 0x1af   :  { %173 = dma.vmem_to_hbm [thread:$0]  %s166_s27, 256, %s168_s30, [#allocation4], %s303_s20, %s303_s20, %s304_s21  }
 0x1b0   :  { %300 = dma.done.wait [#allocation4], 256  }
 0x1b1   :  { %301 = vsyncadd [#allocation4], 4294967040 }
 0x1b2   :  { %178 = vsyncpa [#allocation3], 1 }
 0x1b3   :  { %179 = vsyncpa [#allocation6], 1 }
 0x1b4   :  { %180 = vsyncpa [#allocation4], 1 }

// kernel: tpu_custom_call.1
= control target key start
LH: loop header
LB: loop body
LE: loop exit
PB: predicated region body
PF: predicated region fallthrough
CT: control target
= control target key end

     0   :  { %8 = vsyncpa [#allocation3], 0  ;;  %s371_s0 = inlined_call_operand.hbm [shape: f32[16,32], index: 0, kind: input, shape index: {}]   ;;  %s372_s1 = inlined_call_operand.hbm [shape: f32[32,32], index: 1, kind: input, shape index: {}]   ;;  %s373_s2 = inlined_call_operand.hbm [shape: f32[3,32], index: 2, kind: input, shape index: {}]   ;;  %s374_s3 = inlined_call_operand.hbm [shape: f32[16,32], index: 3, kind: output, shape index: {}]  }
   0x1   :  { %9 = vsyncpa [#allocation6], 0 }
   0x2   :  { %10 = vsyncpa [#allocation4], 0  ;;  %s28_s14 = sshll.u32 %s372_s1, 4  ;;  %s302_s15 = smov [#allocation5]   ;;  %s29_s14 = int_to_ptr.hbm [resolvable:$true] %s28_s14 }
   0x3   :  { %s30_s16 = sshll.u32 %s302_s15, 4  ;;  %s15_s19 = sshll.u32 %s371_s0, 4  ;;  %s31_s16 = int_to_ptr.vmem [resolvable:$true] %s30_s16  ;;  %s16_s19 = int_to_ptr.hbm [resolvable:$true] %s15_s19 }
   0x4   :  { %s303_s20 = smov 128   ;;  %s304_s21 = smov 8  }
   0x5   :  { %36 = dma.hbm_to_vmem [thread:$0]  %s29_s14, 512, %s31_s16, [#allocation6], %s303_s20, %s303_s20, %s304_s21  }
   0x6   :  { %s305_s22 = smov [#allocation2]   ;;  %s42_s1 = sshll.u32 %s373_s2, 4  ;;  %s43_s1 = int_to_ptr.hbm [resolvable:$true] %s42_s1 }
   0x7   :  { %s17_s23 = sshll.u32 %s305_s22, 4  ;;  %s306_s0 = smov [#allocation7]   ;;  %s18_s23 = int_to_ptr.vmem [resolvable:$true] %s17_s23 }
   0x8   :  { %23 = dma.hbm_to_vmem [thread:$0]  %s16_s19, 256, %s18_s23, [#allocation3], %s303_s20, %s303_s20, %s304_s21  }
   0x9   :  { %s44_s26 = sshll.u32 %s306_s0, 4  ;;  %s45_s26 = int_to_ptr.vmem [resolvable:$true] %s44_s26 }
   0xa   :  { %47 = dma.hbm_to_vmem [thread:$0]  %s43_s1, 64, %s45_s26, [#allocation6]  }
   0xb   :  { %296 = dma.done.wait [#allocation3], 256  }
   0xc   :  { %297 = vsyncadd [#allocation3], 4294967040 }
   0xd   :  { %298 = dma.done.wait [#allocation6], 576  }
   0xe   :  { %299 = vsyncadd [#allocation6], 4294966720  ;;  %v65_v0 = vld [vmem:[#allocation5 + $0x18] sm:$0xff]  ;;  %v64_v1 = vld [vmem:[#allocation5 + $0x10] sm:$0xff]  ;;  %vm68_vm0 = vcmask 261120   ;;  %v307_v14 = vmov 32.0  }
   0xf   :  { %87 = vmatpush.msra.mxu0 %v65_v0  ;;  %183 = vmatpush.msra.mxu1 %v65_v0  ;;  %v63_v2 = vld [vmem:[#allocation5 + $0x8] sm:$0xff]  ;;  %v62_v3 = vld [vmem:[#allocation5] sm:$0xff]  ;;  %v344_v4 = vld [vmem:[#allocation2] sm:$0xff]  ;;  %194 = vrcp.f32 %v307_v14  ;;  %s308_s2 = smov [#allocation8]   ;;  %s167_s30 = sshll.u32 %s374_s3, 4  ;;  %s168_s30 = int_to_ptr.hbm [resolvable:$true] %s167_s30 }
  0x10   :  { %v346_v5 = vld [vmem:[#allocation2 + $0x8] sm:$0xff]  ;;  %v352_v6 = vld [vmem:[#allocation7] sm:$0x7]  ;;  %s165_s27 = sshll.u32 %s308_s2, 4  ;;  %s166_s27 = int_to_ptr.vmem [resolvable:$true] %s165_s27 }
  0x11   :  { %88 = vmatpush.msra.mxu0 %v64_v1  ;;  %184 = vmatpush.msra.mxu1 %v64_v1  ;;  %v67_v7 = vperm.slane %v352_v6, 0  ;;  %v149_v45 = vperm.slane %v352_v6, 1  ;;  %v152_v48 = vperm.slane %v352_v6, 2 }
  0x13   :  { %89 = vmatpush.msra.mxu0 %v63_v2  ;;  %185 = vmatpush.msra.mxu1 %v63_v2 }
  0x15   :  { %90 = vmatpush.msra.mxu0 %v62_v3  ;;  %186 = vmatpush.msra.mxu1 %v62_v3  ;;  %v195_v15 = vpop.eup %194 }
  0x16   :  { %181 = vmatmul.msk.f32.vlgmr.msra.gmra.mxu0 %vm68_vm0, %v344_v4  ;;  %182 = vmatmul.msk.f32.vlgmr.msra.gmra.mxu1 %vm68_vm0, %v346_v5  ;;  %v105_v16 = vmul.f32 32.0, %v195_v15  ;;  %vm109_vm1 = vweird.f32 %v195_v15 }
  0x18   :  { %v106_v17 = vsub.f32 1.0, %v105_v16 }
  0x1a   :  { %v107_v18 = vmul.f32 %v195_v15, %v106_v17 }
  0x1c   :  { %v108_v19 = vadd.f32 %v195_v15, %v107_v18 }
  0x1e   :  { %v110_v20 = vsel %vm109_vm1, %v195_v15, %v108_v19 }
  0x93   :  { %v92_v8 = vpop.f32.mrf.mxu0  ;;  %v95_v10 = vpop.f32.mrf.mxu1 }
  0x94   :  { %v93_v9 = vadd.f32 %v92_v8, %v67_v7  ;;  %v96_v12 = vadd.f32 %v95_v10, %v67_v7 }
  0x96   :  { %v98_v11 = vsel %vm68_vm0, %v93_v9, 0.0  ;;  %v101_v13 = vsel %vm68_vm0, %v96_v12, 0.0 }
  0x97   :  { %99 = vadd.xlane.f32.xlu0 %v98_v11 }
  0x9f   :  { %102 = vadd.xlane.f32.xlu0 %v101_v13 }
 0x10a   :  { %v100_v21 = vpop.xlane.xlu0 %99 }
 0x10b   :  { %v111_v22 = vmul.f32 %v110_v20, %v100_v21 }
 0x10d   :  { %v113_v23 = vsub.f32 %v93_v9, %v111_v22 }
 0x10f   :  { %v115_v24 = vmul.f32 %v113_v23, %v113_v23 }
 0x111   :  { %v117_v25 = vsel %vm68_vm0, %v115_v24, 0.0 }
 0x112   :  { %118 = vadd.xlane.f32.xlu1 %v117_v25  ;;  %v103_v26 = vpop.xlane.xlu0 %102 }
 0x113   :  { %v112_v27 = vmul.f32 %v110_v20, %v103_v26 }
 0x115   :  { %v114_v28 = vsub.f32 %v96_v12, %v112_v27 }
 0x117   :  { %v116_v29 = vmul.f32 %v114_v28, %v114_v28 }
 0x119   :  { %v120_v30 = vsel %vm68_vm0, %v116_v29, 0.0 }
 0x11a   :  { %121 = vadd.xlane.f32.xlu1 %v120_v30 }
 0x185   :  { %v119_v31 = vpop.xlane.xlu1 %118 }
 0x186   :  { %v123_v32 = vmul.f32 %v119_v31, %v110_v20 }
 0x188   :  { %v125_v33 = vadd.f32 1e-05, %v123_v32 }
 0x18a   :  { %196 = vrsqrt.f32 %v125_v33  ;;  %vm133_vm3 = vweird.f32 %v125_v33 }
 0x18d   :  { %v122_v34 = vpop.xlane.xlu1 %121 }
 0x18e   :  { %v124_v35 = vmul.f32 %v122_v34, %v110_v20 }
 0x190   :  { %v197_v36 = vpop.eup %196  ;;  %v126_v37 = vadd.f32 1e-05, %v124_v35 }
 0x191   :  { %v128_v38 = vmul.f32 %v197_v36, %v125_v33  ;;  %vm134_vm2 = vweird.f32 %v197_v36 }
 0x192   :  { %198 = vrsqrt.f32 %v126_v37  ;;  %vm135_vm4 = vmor %vm133_vm3, %vm134_vm2  ;;  %vm143_vm6 = vweird.f32 %v126_v37 }
 0x193   :  { %v129_v39 = vmul.f32 %v197_v36, %v128_v38 }
 0x195   :  { %v130_v40 = vmul.f32 0.5, %v129_v39 }
 0x197   :  { %v131_v41 = vsub.f32 1.5, %v130_v40 }
 0x198   :  { %v199_v42 = vpop.eup %198 }
 0x199   :  { %v132_v43 = vmul.f32 %v197_v36, %v131_v41  ;;  %v138_v44 = vmul.f32 %v199_v42, %v126_v37  ;;  %vm144_vm5 = vweird.f32 %v199_v42 }
 0x19a   :  { %vm145_vm7 = vmor %vm143_vm6, %vm144_vm5 }
 0x19b   :  { %v136_v46 = vsel %vm135_vm4, %v197_v36, %v132_v43  ;;  %v139_v47 = vmul.f32 %v199_v42, %v138_v44 }
 0x19c   :  { %v147_v49 = vmul.f32 %v136_v46, %v113_v23 }
 0x19d   :  { %v140_v50 = vmul.f32 0.5, %v139_v47 }
 0x19e   :  { %v150_v51 = vmul.f32 %v149_v45, %v147_v49 }
 0x19f   :  { %v141_v52 = vsub.f32 1.5, %v140_v50 }
 0x1a0   :  { %v153_v53 = vadd.f32 %v152_v48, %v150_v51 }
 0x1a1   :  { %v142_v54 = vmul.f32 %v199_v42, %v141_v52 }
 0x1a2   :  { %v155_v55 = vmax.f32 %v153_v53, 0.0 }
 0x1a3   :  { %v146_v56 = vsel %vm145_vm7, %v199_v42, %v142_v54 }
 0x1a4   :  { %v148_v57 = vmul.f32 %v146_v56, %v114_v28  ;;  %v157_v58 = vadd.f32 %v155_v55, %v344_v4 }
 0x1a6   :  { %v151_v59 = vmul.f32 %v149_v45, %v148_v57  ;;  %159 = vst.msk [vmem:[#allocation8] sm:$0xff] %vm68_vm0, %v157_v58 }
 0x1a8   :  { %v154_v60 = vadd.f32 %v152_v48, %v151_v59 }
 0x1aa   :  { %v156_v61 = vmax.f32 %v154_v60, 0.0 }
 0x1ac   :  { %v158_v62 = vadd.f32 %v156_v61, %v346_v5 }
 0x1ae   :  { %160 = vst.msk [vmem:[#allocation8 + $0x8] sm:$0xff] %vm68_vm0, %v158_v62 }
 0x1af   :  { %173 = dma.vmem_to_hbm [thread:$0]  %s166_s27, 256, %s168_s30, [#allocation4], %s303_s20, %s303_s20, %s304_s21  }
 0x1b0   :  { %300 = dma.done.wait [#allocation4], 256  }
 0x1b1   :  { %301 = vsyncadd [#allocation4], 4294967040 }
 0x1b2   :  { %178 = vsyncpa [#allocation3], 1 }
 0x1b3   :  { %179 = vsyncpa [#allocation6], 1 }
 0x1b4   :  { %180 = vsyncpa [#allocation4], 1 }

</bundles_post_ra>
